<compile_context>
chip_gen: v5e
topology: v5e:2x2
jax: 0.10.0
libtpu: 0.0.40
codegen_flags: <defaults>
</compile_context>

<pallas_src>
import functools

import jax
import jax.numpy as jnp
from jax.experimental import pallas as pl
from jax.experimental.pallas import tpu as pltpu

BN_EPS = 1e-5          # PyTorch BatchNorm1d default
HEAD_PAD = 8           # 1 (regr) + 4 (ovr) + 1 (binary) -> padded to 8 rows


def _round_up(x, m):
    return (x + m - 1) // m * m


def _choose_tiling(B, block_b):
    """Balanced batch tiles (multiples of 128 lanes); >=2 tiles for big B (v7x)."""
    n_tiles = max(1, -(-B // block_b))
    # Keep an even number of tiles once the batch is large enough, so the
    # "parallel" axis can be split across v7x's two TensorCores.
    if n_tiles % 2 == 1 and B >= 2048:
        n_tiles += 1
    tb = _round_up(-(-B // n_tiles), 128)
    return tb, n_tiles * tb


def _dsb_kernel(nc_ref, cat_ref, w1T_ref, embwT_ref, w2T_ref, b2_ref,
                whT_ref, bh_ref, out_ref, *, offsets):
    """One batch tile of the fused MLP, feature-major ([feature, batch]).

    nc_ref   : [n_nc+1, TB]   bf16  non-cat features + trailing ones row (bias lane)
    cat_ref  : [n_cat,  TB]   int32 categorical ids
    w1T_ref  : [150, n_nc+1]  bf16  (lin1 non-cat slice, BN1 folded)^T; last col = bias
    embwT_ref: [150, sum_n]   bf16  (emb_table @ w1_emb slice, BN1 folded)^T
    w2T_ref  : [50, 150]      bf16  (lin2, BN2 folded)^T
    b2_ref   : [50, 1]        f32   folded lin2+bn2 bias
    whT_ref  : [8, 50]        bf16  fused heads [regr | ovr(4) | binary | pad(2)]^T
    bh_ref   : [8, 1]         f32   fused head bias
    out_ref  : [8, TB]        f32
    """
    tb = nc_ref.shape[1]
    sum_n = embwT_ref.shape[1]

    # ---- lin1 (+bn1 +bias folded): non-categorical contribution ----
    h1 = jnp.dot(w1T_ref[...], nc_ref[...], preferred_element_type=jnp.float32)

    # ---- embedding lookup as a one-hot matmul (no [B, D_in] ever hits HBM) ----
    cat = cat_ref[...]
    row = jax.lax.broadcasted_iota(jnp.int32, (sum_n, tb), 0)
    hit = (cat[0:1, :] + offsets[0]) == row
    for j in range(1, len(offsets)):
        hit = jnp.logical_or(hit, (cat[j:j + 1, :] + offsets[j]) == row)
    h1 = h1 + jnp.dot(embwT_ref[...], hit.astype(jnp.bfloat16),
                      preferred_element_type=jnp.float32)

    # relu (emb_drop / drop are identity in eval mode)
    h1 = jnp.maximum(h1, 0.0)

    # ---- lin2 (+bn2 folded) + relu ----
    h2 = jnp.dot(w2T_ref[...], h1.astype(jnp.bfloat16),
                 preferred_element_type=jnp.float32) + b2_ref[...]
    h2 = jnp.maximum(h2, 0.0)

    # ---- fused heads: one [8, 50] matmul, one lane-dense output slab ----
    z = jnp.dot(whT_ref[...], h2.astype(jnp.bfloat16),
                preferred_element_type=jnp.float32) + bh_ref[...]

    # row 0: relu+clamp(0,1) == clip(0,1); rows 1..5: sigmoid; rows 6,7: padding.
    r = jax.lax.broadcasted_iota(jnp.int32, z.shape, 0)
    out_ref[...] = jnp.where(r == 0, jnp.clip(z, 0.0, 1.0), jax.nn.sigmoid(z))


def dsb_regression_ovr_binary_forward(non_cat, cat, params, *, block_b=4096):
    """Returns (regr [B], ovr [B,4], binary [B]) matching the PyTorch forward (eval)."""
    B, n_nc = non_cat.shape

    # ---------- fold BatchNorm (eval) into the Linear weights ----------
    s1 = params["bn1_g"] * jax.lax.rsqrt(params["bn1_v"] + BN_EPS)        # [1,150]
    b1f = (params["b1"] - params["bn1_m"]) * s1 + params["bn1_b"]         # [1,150]
    s2 = params["bn2_g"] * jax.lax.rsqrt(params["bn2_v"] + BN_EPS)        # [1,50]
    b2f = (params["b2"] - params["bn2_m"]) * s2 + params["bn2_b"]         # [1,50]

    w1 = params["w1"]                                                     # [d_in,150]
    # Non-cat slice with BN folded, plus the folded bias as an extra input row.
    w1ncT = jnp.concatenate([w1[:n_nc] * s1, b1f], axis=0).T.astype(jnp.bfloat16)

    # Pre-multiply each embedding table by its slice of w1 so the in-kernel
    # lookup is a one-hot matmul against [n_categories_j, 150] rows.
    blocks, offsets = [], []
    rowi, off = n_nc, 0
    for tbl in params["emb_tables"]:
        n_j, d_j = tbl.shape
        blocks.append(tbl @ w1[rowi:rowi + d_j])
        offsets.append(off)
        rowi += d_j
        off += n_j
    embwT = (jnp.concatenate(blocks, axis=0) * s1).T.astype(jnp.bfloat16)  # [150,sum_n]

    w2T = (params["w2"] * s2).T.astype(jnp.bfloat16)                       # [50,150]
    b2c = b2f.T                                                            # [50,1]

    # Fuse the three heads into one zero-padded [8, 50] weight.
    wh = jnp.concatenate([params["wr"], params["wo"], params["wb"]], axis=1)  # [50,6]
    bh = jnp.concatenate([params["br"], params["bo"], params["bb"]], axis=1)  # [1,6]
    whT = jnp.pad(wh, ((0, 0), (0, HEAD_PAD - wh.shape[1]))).T.astype(jnp.bfloat16)
    bhc = jnp.pad(bh, ((0, 0), (0, HEAD_PAD - bh.shape[1]))).T                # [8,1]

    # ---------- feature-major inputs + batch (lane) tiling ----------
    # Clip ids into each table's valid range (nn.Embedding would raise instead).
    maxids = jnp.array([tbl.shape[0] - 1 for tbl in params["emb_tables"]],
                       dtype=jnp.int32)
    cat_T = jnp.clip(cat.astype(jnp.int32), 0, maxids[None, :]).T           # [n_cat,B]
    nc_aug = jnp.concatenate(
        [non_cat.T, jnp.ones((1, B), non_cat.dtype)], axis=0
    ).astype(jnp.bfloat16)                                                   # [n_nc+1,B]

    TB, Bp = _choose_tiling(B, block_b)
    if Bp != B:
        nc_aug = jnp.pad(nc_aug, ((0, 0), (0, Bp - B)))
        cat_T = jnp.pad(cat_T, ((0, 0), (0, Bp - B)))

    def batch_spec(rows):
        return pl.BlockSpec((rows, TB), lambda i: (0, i))

    def const_spec(a):
        # Constant block index -> weights stay resident in VMEM across the grid.
        return pl.BlockSpec(a.shape, lambda i: (0, 0))

    out = pl.pallas_call(
        functools.partial(_dsb_kernel, offsets=tuple(offsets)),
        grid=(Bp // TB,),
        in_specs=[
            batch_spec(n_nc + 1), batch_spec(cat_T.shape[0]),
            const_spec(w1ncT), const_spec(embwT),
            const_spec(w2T), const_spec(b2c),
            const_spec(whT), const_spec(bhc),
        ],
        out_specs=pl.BlockSpec((HEAD_PAD, TB), lambda i: (0, i)),
        out_shape=jax.ShapeDtypeStruct((HEAD_PAD, Bp), jnp.float32),
        compiler_params=pltpu.CompilerParams(
            dimension_semantics=("parallel",),
            vmem_limit_bytes=32 * 1024 * 1024),
    )(nc_aug, cat_T, w1ncT, embwT, w2T, b2c, whT, bhc)

    x_regr = out[0, :B]          # .view(-1)
    x_ovr = out[1:5, :B].T
    x_bin = out[5, :B]           # .view(-1)
    return x_regr, x_ovr, x_bin


def _reference_forward(non_cat, cat, params):
    """Pure-JAX f32 reference mirroring the PyTorch module (eval mode)."""
    emb = jnp.concatenate(
        [tbl[cat[:, j]] for j, tbl in enumerate(params["emb_tables"])], axis=1)
    x = jnp.concatenate([non_cat, emb], axis=1)

    def bn(h, g, b, m, v):
        return (h - m) * jax.lax.rsqrt(v + BN_EPS) * g + b

    h1 = jnp.maximum(bn(x @ params["w1"] + params["b1"], params["bn1_g"],
                        params["bn1_b"], params["bn1_m"], params["bn1_v"]), 0.0)
    h2 = jnp.maximum(bn(h1 @ params["w2"] + params["b2"], params["bn2_g"],
                        params["bn2_b"], params["bn2_m"], params["bn2_v"]), 0.0)
    regr = jnp.clip(jnp.maximum(h2 @ params["wr"] + params["br"], 0.0), 0.0, 1.0)
    ovr = jax.nn.sigmoid(h2 @ params["wo"] + params["bo"])
    binv = jax.nn.sigmoid(h2 @ params["wb"] + params["bb"])
    return regr.reshape(-1), ovr, binv.reshape(-1)


def init_params(key, cat_dims, n_non_categorical):
    """Deterministic synthetic parameters matching the PyTorch module shapes."""
    n_emb_out = sum(y for _, y in cat_dims)
    d_in = n_non_categorical + n_emb_out
    keys = iter(jax.random.split(key, 32))

    def rnd(shape, scale=0.1):
        return (scale * jax.random.normal(next(keys), shape)).astype(jnp.float32)

    return {
        "emb_tables": [rnd((n, d), scale=0.5) for n, d in cat_dims],
        # Linear weights stored as [in, out] (transpose of torch's [out, in]).
        "w1": rnd((d_in, 150)), "b1": rnd((1, 150)),
        "bn1_g": (1.0 + rnd((1, 150))), "bn1_b": rnd((1, 150)),
        "bn1_m": rnd((1, 150)), "bn1_v": (0.5 + jnp.abs(rnd((1, 150)))),
        "w2": rnd((150, 50)), "b2": rnd((1, 50)),
        "bn2_g": (1.0 + rnd((1, 50))), "bn2_b": rnd((1, 50)),
        "bn2_m": rnd((1, 50)), "bn2_v": (0.5 + jnp.abs(rnd((1, 50)))),
        "wr": rnd((50, 1)), "br": rnd((1, 1)),
        "wo": rnd((50, 4)), "bo": rnd((1, 4)),
        "wb": rnd((50, 1)), "bb": rnd((1, 1)),
    }


if __name__ == "__main__":
    key = jax.random.PRNGKey(0)

    cat_dims = [(10, 4), (7, 3), (5, 2)]      # 3 categorical cols, emb dims 4+3+2=9
    n_non_categorical = 6
    batch = 8

    k_p, k_nc, k_c = jax.random.split(key, 3)
    params = init_params(k_p, cat_dims, n_non_categorical)

    non_cat = jax.random.normal(k_nc, (batch, n_non_categorical), dtype=jnp.float32)
    cat = jnp.stack(
        [jax.random.randint(jax.random.fold_in(k_c, j), (batch,), 0, n)
         for j, (n, _) in enumerate(cat_dims)],
        axis=1,
    ).astype(jnp.int32)

    fwd = jax.jit(functools.partial(dsb_regression_ovr_binary_forward, params=params))
    x_regr, x_ovr, x_bin = fwd(non_cat, cat)
    jax.block_until_ready((x_regr, x_ovr, x_bin))

    assert x_regr.shape == (batch,), x_regr.shape
    assert x_ovr.shape == (batch, 4), x_ovr.shape
    assert x_bin.shape == (batch,), x_bin.shape
    assert bool(jnp.all((x_regr >= 0.0) & (x_regr <= 1.0)))
    assert bool(jnp.all((x_ovr > 0.0) & (x_ovr < 1.0)))
    assert bool(jnp.all((x_bin > 0.0) & (x_bin < 1.0)))

    # Compare against the f32 pure-JAX reference (bf16 folded weights -> loose tol).
    r_regr, r_ovr, r_bin = _reference_forward(non_cat, cat, params)
    assert bool(jnp.allclose(x_regr, r_regr, atol=3e-2)), jnp.max(jnp.abs(x_regr - r_regr))
    assert bool(jnp.allclose(x_ovr, r_ovr, atol=3e-2)), jnp.max(jnp.abs(x_ovr - r_ovr))
    assert bool(jnp.allclose(x_bin, r_bin, atol=3e-2)), jnp.max(jnp.abs(x_bin - r_bin))

    print("KERNEL_OK")
</pallas_src>

<mosaic_0001>
module attributes {stable_mosaic.version = 11 : i64} {
  func.func @_dsb_kernel(%arg0: i32, %arg1: memref<7x128xbf16, #tpu.memory_space<vmem>>, %arg2: memref<3x128xi32, #tpu.memory_space<vmem>>, %arg3: memref<150x7xbf16, #tpu.memory_space<vmem>>, %arg4: memref<150x22xbf16, #tpu.memory_space<vmem>>, %arg5: memref<50x150xbf16, #tpu.memory_space<vmem>>, %arg6: memref<50x1xf32, #tpu.memory_space<vmem>>, %arg7: memref<8x50xbf16, #tpu.memory_space<vmem>>, %arg8: memref<8x1xf32, #tpu.memory_space<vmem>>, %arg9: memref<8x128xf32, #tpu.memory_space<vmem>>) attributes {dimension_semantics = [#tpu.dimension_semantics<parallel>], iteration_bounds = array<i64: 1>, scalar_prefetch = 0 : i64, scratch_operands = 0 : i64, tpu.core_type = #tpu.core_type<tc>, window_params = [{transform_indices = @transform_0, window_bounds = array<i64: 7, 128>}, {transform_indices = @transform_1, window_bounds = array<i64: 3, 128>}, {pipeline_mode = #tpu.pipeline_mode<synchronous>, transform_indices = @transform_2, window_bounds = array<i64: 150, 7>}, {pipeline_mode = #tpu.pipeline_mode<synchronous>, transform_indices = @transform_3, window_bounds = array<i64: 150, 22>}, {pipeline_mode = #tpu.pipeline_mode<synchronous>, transform_indices = @transform_4, window_bounds = array<i64: 50, 150>}, {pipeline_mode = #tpu.pipeline_mode<synchronous>, transform_indices = @transform_5, window_bounds = array<i64: 50, 1>}, {pipeline_mode = #tpu.pipeline_mode<synchronous>, transform_indices = @transform_6, window_bounds = array<i64: 8, 50>}, {pipeline_mode = #tpu.pipeline_mode<synchronous>, transform_indices = @transform_7, window_bounds = array<i64: 8, 1>}, {transform_indices = @transform_8, window_bounds = array<i64: 8, 128>}]} {
    %c0 = arith.constant 0 : index
    %c0_0 = arith.constant 0 : index
    %0 = vector.load %arg3[%c0, %c0_0] : memref<150x7xbf16, #tpu.memory_space<vmem>>, vector<150x7xbf16>
    %c0_1 = arith.constant 0 : index
    %c0_2 = arith.constant 0 : index
    %1 = vector.load %arg1[%c0_1, %c0_2] : memref<7x128xbf16, #tpu.memory_space<vmem>>, vector<7x128xbf16>
    %cst = arith.constant dense<0.000000e+00> : vector<150x128xf32>
    %2 = tpu.matmul %0, %1, %cst {dimension_numbers = #tpu.dot_dimension_numbers<[1], [0], [0], [1], [0, 0, 1, 1], [], []>} : vector<150x7xbf16>, vector<7x128xbf16>, vector<150x128xf32> -> vector<150x128xf32>
    %c0_3 = arith.constant 0 : index
    %c0_4 = arith.constant 0 : index
    %3 = vector.load %arg2[%c0_3, %c0_4] : memref<3x128xi32, #tpu.memory_space<vmem>>, vector<3x128xi32>
    %4 = tpu.iota {dimensions = array<i32: 0>} : vector<22x128xi32>
    %5 = vector.extract_strided_slice %3 {offsets = [0, 0], sizes = [1, 128], strides = [1, 1]} : vector<3x128xi32> to vector<1x128xi32>
    %c0_i32 = arith.constant 0 : i32
    %6 = vector.broadcast %c0_i32 : i32 to vector<1x128xi32>
    %7 = arith.addi %5, %6 : vector<1x128xi32>
    %8 = vector.broadcast %7 : vector<1x128xi32> to vector<22x128xi32>
    %9 = arith.cmpi eq, %8, %4 : vector<22x128xi32>
    %10 = vector.extract_strided_slice %3 {offsets = [1, 0], sizes = [1, 128], strides = [1, 1]} : vector<3x128xi32> to vector<1x128xi32>
    %c10_i32 = arith.constant 10 : i32
    %11 = vector.broadcast %c10_i32 : i32 to vector<1x128xi32>
    %12 = arith.addi %10, %11 : vector<1x128xi32>
    %13 = vector.broadcast %12 : vector<1x128xi32> to vector<22x128xi32>
    %14 = arith.cmpi eq, %13, %4 : vector<22x128xi32>
    %15 = arith.ori %9, %14 : vector<22x128xi1>
    %16 = vector.extract_strided_slice %3 {offsets = [2, 0], sizes = [1, 128], strides = [1, 1]} : vector<3x128xi32> to vector<1x128xi32>
    %c17_i32 = arith.constant 17 : i32
    %17 = vector.broadcast %c17_i32 : i32 to vector<1x128xi32>
    %18 = arith.addi %16, %17 : vector<1x128xi32>
    %19 = vector.broadcast %18 : vector<1x128xi32> to vector<22x128xi32>
    %20 = arith.cmpi eq, %19, %4 : vector<22x128xi32>
    %21 = arith.ori %15, %20 : vector<22x128xi1>
    %c0_5 = arith.constant 0 : index
    %c0_6 = arith.constant 0 : index
    %22 = vector.load %arg4[%c0_5, %c0_6] : memref<150x22xbf16, #tpu.memory_space<vmem>>, vector<150x22xbf16>
    %23 = arith.extui %21 : vector<22x128xi1> to vector<22x128xi32>
    %24 = arith.sitofp %23 : vector<22x128xi32> to vector<22x128xf32>
    %25 = arith.truncf %24 : vector<22x128xf32> to vector<22x128xbf16>
    %cst_7 = arith.constant dense<0.000000e+00> : vector<150x128xf32>
    %26 = tpu.matmul %22, %25, %cst_7 {dimension_numbers = #tpu.dot_dimension_numbers<[1], [0], [0], [1], [0, 0, 1, 1], [], []>} : vector<150x22xbf16>, vector<22x128xbf16>, vector<150x128xf32> -> vector<150x128xf32>
    %27 = arith.addf %2, %26 : vector<150x128xf32>
    %cst_8 = arith.constant 0.000000e+00 : f32
    %28 = vector.broadcast %cst_8 : f32 to vector<150x128xf32>
    %29 = arith.maximumf %27, %28 : vector<150x128xf32>
    %c0_9 = arith.constant 0 : index
    %c0_10 = arith.constant 0 : index
    %30 = vector.load %arg5[%c0_9, %c0_10] : memref<50x150xbf16, #tpu.memory_space<vmem>>, vector<50x150xbf16>
    %31 = arith.truncf %29 : vector<150x128xf32> to vector<150x128xbf16>
    %cst_11 = arith.constant dense<0.000000e+00> : vector<50x128xf32>
    %32 = tpu.matmul %30, %31, %cst_11 {dimension_numbers = #tpu.dot_dimension_numbers<[1], [0], [0], [1], [0, 0, 1, 1], [], []>} : vector<50x150xbf16>, vector<150x128xbf16>, vector<50x128xf32> -> vector<50x128xf32>
    %c0_12 = arith.constant 0 : index
    %c0_13 = arith.constant 0 : index
    %33 = vector.load %arg6[%c0_12, %c0_13] : memref<50x1xf32, #tpu.memory_space<vmem>>, vector<50x1xf32>
    %34 = vector.broadcast %33 : vector<50x1xf32> to vector<50x128xf32>
    %35 = arith.addf %32, %34 : vector<50x128xf32>
    %cst_14 = arith.constant 0.000000e+00 : f32
    %36 = vector.broadcast %cst_14 : f32 to vector<50x128xf32>
    %37 = arith.maximumf %35, %36 : vector<50x128xf32>
    %c0_15 = arith.constant 0 : index
    %c0_16 = arith.constant 0 : index
    %38 = vector.load %arg7[%c0_15, %c0_16] : memref<8x50xbf16, #tpu.memory_space<vmem>>, vector<8x50xbf16>
    %39 = arith.truncf %37 : vector<50x128xf32> to vector<50x128xbf16>
    %cst_17 = arith.constant dense<0.000000e+00> : vector<8x128xf32>
    %40 = tpu.matmul %38, %39, %cst_17 {dimension_numbers = #tpu.dot_dimension_numbers<[1], [0], [0], [1], [0, 0, 1, 1], [], []>} : vector<8x50xbf16>, vector<50x128xbf16>, vector<8x128xf32> -> vector<8x128xf32>
    %c0_18 = arith.constant 0 : index
    %c0_19 = arith.constant 0 : index
    %41 = vector.load %arg8[%c0_18, %c0_19] : memref<8x1xf32, #tpu.memory_space<vmem>>, vector<8x1xf32>
    %42 = vector.broadcast %41 : vector<8x1xf32> to vector<8x128xf32>
    %43 = arith.addf %40, %42 : vector<8x128xf32>
    %44 = tpu.iota {dimensions = array<i32: 0>} : vector<8x128xi32>
    %c0_i32_20 = arith.constant 0 : i32
    %45 = vector.broadcast %c0_i32_20 : i32 to vector<8x128xi32>
    %46 = arith.cmpi eq, %44, %45 : vector<8x128xi32>
    %cst_21 = arith.constant 0.000000e+00 : f32
    %cst_22 = arith.constant 1.000000e+00 : f32
    %47 = vector.broadcast %cst_21 : f32 to vector<8x128xf32>
    %48 = arith.maximumf %47, %43 : vector<8x128xf32>
    %49 = vector.broadcast %cst_22 : f32 to vector<8x128xf32>
    %50 = arith.minimumf %49, %48 : vector<8x128xf32>
    %51 = arith.negf %43 : vector<8x128xf32>
    %52 = math.exp %51 : vector<8x128xf32>
    %cst_23 = arith.constant 1.000000e+00 : f32
    %53 = vector.broadcast %cst_23 : f32 to vector<8x128xf32>
    %54 = arith.addf %53, %52 : vector<8x128xf32>
    %55 = arith.divf %53, %54 : vector<8x128xf32>
    %56 = arith.select %46, %50, %55 : vector<8x128xi1>, vector<8x128xf32>
    %c0_24 = arith.constant 0 : index
    %c0_25 = arith.constant 0 : index
    %57 = vector.load %arg9[%c0_24, %c0_25] : memref<8x128xf32, #tpu.memory_space<vmem>>, vector<8x128xf32>
    tpu.vector_store %arg9[%c0_24, %c0_25], %56 {strides = array<i32>} : memref<8x128xf32, #tpu.memory_space<vmem>>, vector<8x128xf32>,
    return
  }
  func.func @transform_0(%arg0: i32) -> (i32, i32) {
    %c0_i32 = arith.constant 0 : i32
    %c0_i32_0 = arith.constant 0 : i32
    return %c0_i32, %arg0 : i32, i32
  }
  func.func @transform_1(%arg0: i32) -> (i32, i32) {
    %c0_i32 = arith.constant 0 : i32
    %c0_i32_0 = arith.constant 0 : i32
    return %c0_i32, %arg0 : i32, i32
  }
  func.func @transform_2(%arg0: i32) -> (i32, i32) {
    %c0_i32 = arith.constant 0 : i32
    %c0_i32_0 = arith.constant 0 : i32
    %c0_i32_1 = arith.constant 0 : i32
    return %c0_i32, %c0_i32_0 : i32, i32
  }
  func.func @transform_3(%arg0: i32) -> (i32, i32) {
    %c0_i32 = arith.constant 0 : i32
    %c0_i32_0 = arith.constant 0 : i32
    %c0_i32_1 = arith.constant 0 : i32
    return %c0_i32, %c0_i32_0 : i32, i32
  }
  func.func @transform_4(%arg0: i32) -> (i32, i32) {
    %c0_i32 = arith.constant 0 : i32
    %c0_i32_0 = arith.constant 0 : i32
    %c0_i32_1 = arith.constant 0 : i32
    return %c0_i32, %c0_i32_0 : i32, i32
  }
  func.func @transform_5(%arg0: i32) -> (i32, i32) {
    %c0_i32 = arith.constant 0 : i32
    %c0_i32_0 = arith.constant 0 : i32
    %c0_i32_1 = arith.constant 0 : i32
    return %c0_i32, %c0_i32_0 : i32, i32
  }
  func.func @transform_6(%arg0: i32) -> (i32, i32) {
    %c0_i32 = arith.constant 0 : i32
    %c0_i32_0 = arith.constant 0 : i32
    %c0_i32_1 = arith.constant 0 : i32
    return %c0_i32, %c0_i32_0 : i32, i32
  }
  func.func @transform_7(%arg0: i32) -> (i32, i32) {
    %c0_i32 = arith.constant 0 : i32
    %c0_i32_0 = arith.constant 0 : i32
    %c0_i32_1 = arith.constant 0 : i32
    return %c0_i32, %c0_i32_0 : i32, i32
  }
  func.func @transform_8(%arg0: i32) -> (i32, i32) {
    %c0_i32 = arith.constant 0 : i32
    %c0_i32_0 = arith.constant 0 : i32
    return %c0_i32, %arg0 : i32, i32
  }
}

</mosaic_0001>

<bundles_post_ra>
// kernel: dsb_regression_ovr_binary_forward.1
= control target key start
LH: loop header
LB: loop body
LE: loop exit
PB: predicated region body
PF: predicated region fallthrough
CT: control target
= control target key end

     0   :  { %13 = vsyncpa [#allocation3], 0  ;;  %s1110_s0 = inlined_call_operand.vmem [shape: bf16[7,128], index: 0, kind: input, shape index: {}]   ;;  %s1111_s1 = inlined_call_operand.vmem [shape: s32[3,128], index: 1, kind: input, shape index: {}]   ;;  %s1112_s2 = inlined_call_operand.hbm [shape: bf16[150,7], index: 2, kind: input, shape index: {}]   ;;  %s1113_s3 = inlined_call_operand.hbm [shape: bf16[150,22], index: 3, kind: input, shape index: {}]   ;;  %s1114_s4 = inlined_call_operand.hbm [shape: bf16[50,150], index: 4, kind: input, shape index: {}]   ;;  %s1115_s5 = inlined_call_operand.hbm [shape: f32[50,1], index: 5, kind: input, shape index: {}]   ;;  %s1116_s6 = inlined_call_operand.vmem [shape: bf16[8,50], index: 6, kind: input, shape index: {}]   ;;  %s1117_s7 = inlined_call_operand.vmem [shape: f32[8,1], index: 7, kind: input, shape index: {}]   ;;  %s1118_s8 = inlined_call_operand.vmem [shape: f32[8,128], index: 8, kind: output, shape index: {}]  }
   0x1   :  { %14 = vsyncpa [#allocation5], 0 }
   0x2   :  { %15 = vsyncpa [#allocation8], 0  ;;  %s37_s29 = sshll.u32 %s1113_s3, 4  ;;  %s976_s30 = smov [#allocation4]   ;;  %s38_s29 = int_to_ptr.hbm [resolvable:$true] %s37_s29 }
   0x3   :  { %s39_s9 = sshll.u32 %s976_s30, 4  ;;  %s24_s12 = sshll.u32 %s1112_s2, 4  ;;  %s40_s9 = int_to_ptr.vmem [resolvable:$true] %s39_s9  ;;  %s25_s12 = int_to_ptr.hbm [resolvable:$true] %s24_s12 }
   0x4   :  { %s977_s13 = smov 64   ;;  %s978_s14 = smov 4  }
   0x5   :  { %45 = dma.hbm_to_vmem [thread:$0]  %s38_s29, 1216, %s40_s9, [#allocation5], %s977_s13, %s977_s13, %s978_s14  }
   0x6   :  { %s979_s15 = smov [#allocation2]   ;;  %s50_s19 = sshll.u32 %s1114_s4, 4  ;;  %s51_s19 = int_to_ptr.hbm [resolvable:$true] %s50_s19 }
   0x7   :  { %s26_s16 = sshll.u32 %s979_s15, 4  ;;  %s980_s3 = smov [#allocation6]   ;;  %s27_s16 = int_to_ptr.vmem [resolvable:$true] %s26_s16 }
   0x8   :  { %32 = dma.hbm_to_vmem [thread:$0]  %s25_s12, 1216, %s27_s16, [#allocation3], %s977_s13, %s977_s13, %s978_s14  }
   0x9   :  { %s52_s20 = sshll.u32 %s980_s3, 4  ;;  %s63_s2 = sshll.u32 %s1115_s5, 4  ;;  %s53_s20 = int_to_ptr.vmem [resolvable:$true] %s52_s20  ;;  %s64_s2 = int_to_ptr.hbm [resolvable:$true] %s63_s2 }
   0xa   :  { %s981_s23 = smov 128   ;;  %s982_s24 = smov 8  }
   0xb   :  { %58 = dma.hbm_to_vmem [thread:$0]  %s51_s19, 896, %s53_s20, [#allocation5], %s981_s23, %s981_s23, %s982_s24  }
   0xc   :  { %s983_s25 = smov [#allocation7]  }
   0xd   :  { %s65_s26 = sshll.u32 %s983_s25, 4  ;;  %s66_s26 = int_to_ptr.vmem [resolvable:$true] %s65_s26 }
   0xe   :  { %71 = dma.hbm_to_vmem [thread:$0]  %s64_s2, 896, %s66_s26, [#allocation8], %s981_s23, %s981_s23, %s982_s24  }
   0xf   :  { %970 = dma.done.wait [#allocation3], 1216  }
  0x10   :  { %971 = vsyncadd [#allocation3], 4294966080 }
  0x11   :  { %972 = dma.done.wait [#allocation5], 2112  }
  0x12   :  { %973 = vsyncadd [#allocation5], 4294965184 }
  0x13   :  { %974 = dma.done.wait [#allocation8], 896  }
  0x14   :  { %975 = vsyncadd [#allocation8], 4294966400  ;;  %vm244_vm0 = vcmask 1042432   ;;  %v114_v0 = vlaneseq  ;;  %vm385_vm1 = vcmask 1043456   ;;  %v984_v1 = vmov 65535   ;;  %v828_v12 = vld [vmem:[#allocation2] sm:$0xff] }
  0x15   :  { %v386_v2 = vsel %vm244_vm0, 4294967295, %v984_v1  ;;  %v112_v6 = vld [vmem:[%s1110_s0] sm:$0xf]  ;;  %vm1119_vm2 = vcmask 56320   ;;  %v985_v16 = vmov 0.0   ;;  %v837_v20 = vld [vmem:[#allocation4] sm:$0xff] }
  0x16   :  { %v1046_v3 = vshrl.u32 %v114_v0, 7  ;;  %v387_v4 = vsel %vm385_vm1, %v386_v2, 0  ;;  %v113_v7 = vld [vmem:[%s1111_s1] sm:$0x7]  ;;  %v986_v21 = vmov 1.0|1.0  }
  0x17   :  { %v389_v8 = vand.u32 %v387_v4, %v112_v6  ;;  %v118_v9 = vperm.slane %v113_v7, 0  ;;  %v122_v10 = vadd.s32 10, %v113_v7  ;;  %v130_v11 = vadd.s32 17, %v113_v7  ;;  %v829_v22 = vld [vmem:[#allocation2 + $0x8] sm:$0xff]  ;;  %v838_v23 = vld [vmem:[#allocation4 + $0x8] sm:$0xff]  ;;  %v839_v25 = vld [vmem:[#allocation4 + $0x10] sm:$0xff] }
  0x18   :  { %v117_v5 = vadd.s32 16, %v1046_v3  ;;  %v116_v13 = vadd.s32 8, %v1046_v3  ;;  %v830_v24 = vld [vmem:[#allocation2 + $0x10] sm:$0xff]  ;;  %v831_v26 = vld [vmem:[#allocation2 + $0x18] sm:$0xff]  ;;  %v840_v27 = vld [vmem:[#allocation4 + $0x18] sm:$0xff] }
  0x19   :  { %398 = vmatpush.bf16.msra.mxu1 %v389_v8  ;;  %v123_v14 = vperm.slane %v122_v10, 1  ;;  %v131_v15 = vperm.slane %v130_v11, 2  ;;  %854 = vmatpush.bf16.msra.mxu2 %v389_v8  ;;  %vm119_vm6 = vcmp.eq.s32.totalorder %v118_v9, %v1046_v3  ;;  %v832_v28 = vld [vmem:[#allocation2 + $0x20] sm:$0xff]  ;;  %v841_v29 = vld [vmem:[#allocation4 + $0x20] sm:$0xff]  ;;  %v842_v33 = vld [vmem:[#allocation4 + $0x28] sm:$0xff] }
  0x1a   :  { %vm121_vm3 = vcmp.eq.s32.totalorder %v118_v9, %v117_v5  ;;  %vm120_vm9 = vcmp.eq.s32.totalorder %v118_v9, %v116_v13  ;;  %v833_v30 = vld [vmem:[#allocation2 + $0x28] sm:$0xff]  ;;  %v836_v32 = vld [vmem:[#allocation2 + $0x40] sm:$0xff]  ;;  %v834_v34 = vld [vmem:[#allocation2 + $0x30] sm:$0xff] }
  0x1b   :  { %vm126_vm4 = vcmp.eq.s32.totalorder %v123_v14, %v117_v5  ;;  %vm134_vm5 = vcmp.eq.s32.totalorder %v131_v15, %v117_v5  ;;  %vm124_vm7 = vcmp.eq.s32.totalorder %v123_v14, %v1046_v3  ;;  %vm125_vm10 = vcmp.eq.s32.totalorder %v123_v14, %v116_v13  ;;  %v845_v31 = vld [vmem:[#allocation4 + $0x40] sm:$0xff]  ;;  %v156_v35 = vld [vmem:[#allocation4 + $0x48] sm:$0x7]  ;;  %v111_v36 = vld [vmem:[#allocation2 + $0x48] sm:$0x7] }
  0x1c   :  { %788 = vmatmul.msk.bf16.vlgmr.msra.gmra.mxu1 %vm1119_vm2, %v828_v12  ;;  %vm129_vm8 = vmor %vm121_vm3, %vm126_vm4  ;;  %vm132_vm12 = vcmp.eq.s32.totalorder %v131_v15, %v1046_v3  ;;  %vm133_vm14 = vcmp.eq.s32.totalorder %v131_v15, %v116_v13  ;;  %vm213_vm4 = vcmask 179200   ;;  %v202_v37 = vunpack.c.l.b16 %v156_v35  ;;  %v843_v41 = vld [vmem:[#allocation4 + $0x30] sm:$0xff]  ;;  %v844_v43 = vld [vmem:[#allocation4 + $0x38] sm:$0xff] }
  0x1d   :  { %vm137_vm11 = vmor %vm129_vm8, %vm134_vm5  ;;  %vm1120_vm5 = vcmask 56320   ;;  %v343_v38 = vunpack.c.l.b16 %v111_v36  ;;  %v835_v42 = vld [vmem:[#allocation2 + $0x38] sm:$0xff] }
  0x1e   :  { %v703_v17 = vsel %vm137_vm11, 1.0, %v985_v16  ;;  %vm127_vm13 = vmor %vm119_vm6, %vm124_vm7  ;;  %v212_v39 = vpack.c.b16 %v202_v37, %v202_v37 }
  0x1f   :  { %v164_v18 = vpack.c.bf16 %v703_v17, %v703_v17  ;;  %vm128_vm15 = vmor %vm120_vm9, %vm125_vm10  ;;  %v353_v40 = vpack.c.b16 %v343_v38, %v343_v38 }
  0x20   :  { %vm135_vm1 = vmor %vm127_vm13, %vm132_vm12  ;;  %vm649_vm13 = vcmask 408576  }
  0x21   :  { %v246_v19 = vsel %vm244_vm0, %v164_v18, 0  ;;  %vm136_vm2 = vmor %vm128_vm15, %vm133_vm14 }
  0x22   :  { %254 = vmatpush.bf16.msra.mxu0 %v246_v19  ;;  %852 = vmatpush.bf16.msra.mxu3 %v246_v19  ;;  %vm740_vm3 = vmpackc.low %vm136_vm2, %vm135_vm1  ;;  %vm670_vm1 = vcmp.eq.s32.totalorder %v1046_v3, 0 }
  0x23   :  { %vm1121_vm6 = vmmov %vm1120_vm5 }
  0x24   :  { %vm1122_vm2 = vmmov %vm1120_vm5 }
  0x25   :  { %vm1123_vm7 = vmmov %vm1122_vm2 }
  0x26   :  { %741 = vmatpush.bf16.msk.msra.mxu0 %vm740_vm3, %v986_v21  ;;  %853 = vmatpush.bf16.msk.msra.mxu3 %vm740_vm3, %v986_v21  ;;  %vm1124_vm8 = vmmov %vm1122_vm2 }
  0x27   :  { %796 = vmatmul.msk.bf16.vlgmr.msra.gmra.mxu2 %vm1124_vm8, %v836_v32  ;;  %vm1125_vm9 = vmmov %vm1122_vm2 }
  0x28   :  { %vm1126_vm10 = vmmov %vm1122_vm2 }
  0x29   :  { %742 = vmatmul.msk.bf16.vlgmr.msra.gmra.mxu0 %vm213_vm4, %v837_v20  ;;  %750 = vmatmul.msk.bf16.vlgmr.msra.gmra.mxu3 %vm213_vm4, %v845_v31  ;;  %vm1127_vm11 = vmmov %vm1122_vm2 }
  0x2a   :  { %vm1128_vm12 = vmmov %vm1122_vm2 }
  0x2c   :  { %789 = vmatmul.msk.bf16.gmra.mxu1 %vm1120_vm5, %v829_v22 }
  0x37   :  { %797 = vmatmul.msk.bf16.gmra.mxu2 %vm1127_vm11, %v353_v40 }
  0x39   :  { %743 = vmatmul.msk.bf16.gmra.mxu0 %vm213_vm4, %v838_v23  ;;  %751 = vmatmul.msk.bf16.gmra.mxu3 %vm213_vm4, %v212_v39 }
  0x3c   :  { %790 = vmatmul.msk.bf16.gmra.mxu1 %vm1121_vm6, %v830_v24 }
  0x49   :  { %744 = vmatmul.msk.bf16.gmra.mxu0 %vm213_vm4, %v839_v25 }
  0x4c   :  { %791 = vmatmul.msk.bf16.gmra.mxu1 %vm1122_vm2, %v831_v26 }
  0x59   :  { %745 = vmatmul.msk.bf16.gmra.mxu0 %vm213_vm4, %v840_v27 }
  0x5c   :  { %792 = vmatmul.msk.bf16.gmra.mxu1 %vm1123_vm7, %v832_v28 }
  0x69   :  { %746 = vmatmul.msk.bf16.gmra.mxu0 %vm213_vm4, %v841_v29 }
  0x6c   :  { %793 = vmatmul.msk.bf16.gmra.mxu1 %vm1125_vm9, %v833_v30 }
  0x79   :  { %747 = vmatmul.msk.bf16.gmra.mxu0 %vm213_vm4, %v842_v33 }
  0x7c   :  { %794 = vmatmul.msk.bf16.gmra.mxu1 %vm1126_vm10, %v834_v34 }
  0x89   :  { %748 = vmatmul.msk.bf16.gmra.mxu0 %vm213_vm4, %v843_v41 }
  0x8c   :  { %795 = vmatmul.msk.bf16.gmra.mxu1 %vm1128_vm12, %v835_v42 }
  0x99   :  { %749 = vmatmul.msk.bf16.gmra.mxu0 %vm213_vm4, %v844_v43  ;;  %v400_v44 = vpop.f32.mrf.mxu1 }
  0xa1   :  { %v402_v45 = vpop.f32.mrf.mxu1 }
  0xa6   :  { %v257_v46 = vpop.f32.mrf.mxu0 }
  0xa7   :  { %v401_v47 = vadd.f32 %v400_v44, %v257_v46 }
  0xa9   :  { %v405_v48 = vpop.f32.mrf.mxu1  ;;  %v449_v51 = vmax.f32 %v401_v47, 0.0 }
  0xaa   :  { %v440_v24 = vpop.f32.mrf.mxu2 }
  0xac   :  { %v297_v23 = vpop.f32.mrf.mxu3 }
  0xad   :  { %v441_v34 = vadd.f32 %v440_v24, %v297_v23  ;;  %v490_v23 = vld [vmem:[#allocation7 + $0x28] sm:$0xff] }
  0xae   :  { %v259_v49 = vpop.f32.mrf.mxu0  ;;  %v486_v24 = vld [vmem:[#allocation7 + $0x8] sm:$0xff] }
  0xaf   :  { %v403_v50 = vadd.f32 %v402_v45, %v259_v49  ;;  %v465_v39 = vmax.f32 %v441_v34, 0.0  ;;  %v846_v49 = vld [vmem:[#allocation6 + $0x4] sm:$0xf]  ;;  %v816_v34 = vld [vmem:[#allocation6 + $0x20] sm:$0xf] }
  0xb1   :  { %v450_v52 = vmax.f32 %v403_v50, 0.0  ;;  %v407_v53 = vpop.f32.mrf.mxu1  ;;  %v802_v50 = vld [vmem:[#allocation6 + $0x8] sm:$0xf0] }
  0xb2   :  { %v442_v28 = vpop.f32.mrf.mxu2 }
  0xb3   :  { %v1080_v54 = vpack.c.bf16 %v450_v52, %v449_v51  ;;  %v805_v51 = vor.u32 %v846_v49, %v802_v50 }
  0xb4   :  { %v299_v27 = vpop.f32.mrf.mxu3 }
  0xb5   :  { %v443_v35 = vadd.f32 %v442_v28, %v299_v27  ;;  %v487_v28 = vld [vmem:[#allocation7 + $0x10] sm:$0xff] }
  0xb6   :  { %v262_v55 = vpop.f32.mrf.mxu0 }
  0xb7   :  { %v406_v56 = vadd.f32 %v405_v48, %v262_v55  ;;  %v466_v40 = vmax.f32 %v443_v35, 0.0  ;;  %v851_v35 = vld [vmem:[#allocation6 + $0x24] sm:$0xf0] }
  0xb9   :  { %v410_v57 = vpop.f32.mrf.mxu1  ;;  %v451_v60 = vmax.f32 %v406_v56, 0.0  ;;  %v483_v45 = vpack.c.bf16 %v466_v40, %v465_v39 }
  0xba   :  { %v445_v32 = vpop.f32.mrf.mxu2 }
  0xbc   :  { %v302_v31 = vpop.f32.mrf.mxu3 }
  0xbd   :  { %v446_v33 = vadd.f32 %v445_v32, %v302_v31  ;;  %v808_v32 = vld [vmem:[#allocation6 + $0x10] sm:$0xf] }
  0xbe   :  { %v264_v58 = vpop.f32.mrf.mxu0 }
  0xbf   :  { %v408_v59 = vadd.f32 %v407_v53, %v264_v58  ;;  %v467_v36 = vmax.f32 %v446_v33, 0.0  ;;  %v849_v33 = vld [vmem:[#allocation6 + $0x14] sm:$0xf0] }
  0xc1   :  { %v452_v61 = vmax.f32 %v408_v59, 0.0  ;;  %v412_v62 = vpop.f32.mrf.mxu1  ;;  %v484_v38 = vpack.c.bf16 %v467_v36, %v467_v36  ;;  %v817_v36 = vor.u32 %v851_v35, %v816_v34 }
  0xc2   :  { %v447_v44 = vpop.f32.mrf.mxu2 }
  0xc3   :  { %v1082_v63 = vpack.c.bf16 %v452_v61, %v451_v60  ;;  %v573_v41 = vsel %vm244_vm0, %v484_v38, 0  ;;  %vm653_vm0 = vcmask 1040384  }
  0xc4   :  { %v304_v42 = vpop.f32.mrf.mxu3  ;;  %609 = vmatpush.bf16.msrb.mxu3 %v573_v41 }
  0xc6   :  { %v267_v0 = vpop.f32.mrf.mxu0 }
  0xc7   :  { %v411_v1 = vadd.f32 %v410_v57, %v267_v0 }
  0xc8   :  { %610 = vmatpush.bf16.msrb.mxu3 %v483_v45 }
  0xc9   :  { %v415_v2 = vpop.f32.mrf.mxu1  ;;  %v453_v6 = vmax.f32 %v411_v1, 0.0  ;;  %v491_v1 = vld [vmem:[#allocation7 + $0x30] sm:$0x3] }
  0xcb   :  { %822 = vmatmul.msk.bf16.vlgmr.msrb.gmra.mxu3 %vm213_vm4, %v805_v51 }
  0xce   :  { %v269_v4 = vpop.f32.mrf.mxu0 }
  0xcf   :  { %v413_v5 = vadd.f32 %v412_v62, %v269_v4 }
  0xd1   :  { %v454_v7 = vmax.f32 %v413_v5, 0.0  ;;  %v417_v8 = vpop.f32.mrf.mxu1  ;;  %v987_v5 = vmov 0  }
  0xd2   :  { %867 = vset.pattern.permute.xlu0 %v987_v5  ;;  %868 = vset.pattern.permute.xlu1 %v987_v5 }
  0xd3   :  { %v1084_v9 = vpack.c.bf16 %v454_v7, %v453_v6  ;;  %524 = vperm.xlu0 %867, %v491_v1   ;;  %869 = vset.pattern.permute.xlu2 %v987_v5 }
  0xd4   :  { %519 = vperm.xlu1 %868, %v490_v23  }
  0xd6   :  { %v272_v10 = vpop.f32.mrf.mxu0 }
  0xd7   :  { %v416_v11 = vadd.f32 %v415_v2, %v272_v10  ;;  %v848_v10 = vld [vmem:[#allocation6 + $0x14] sm:$0xf] }
  0xd9   :  { %v420_v12 = vpop.f32.mrf.mxu1  ;;  %v455_v15 = vmax.f32 %v416_v11, 0.0  ;;  %v810_v11 = vld [vmem:[#allocation6 + $0x18] sm:$0xf0] }
  0xdc   :  { %504 = vperm.xlu1 %868, %v487_v28   ;;  %v638_v28 = vld [vmem:[%s1116_s6] sm:$0xf] }
  0xde   :  { %v274_v13 = vpop.f32.mrf.mxu0 }
  0xdf   :  { %v418_v14 = vadd.f32 %v417_v8, %v274_v13  ;;  %v813_v13 = vor.u32 %v848_v10, %v810_v11 }
  0xe1   :  { %v456_v16 = vmax.f32 %v418_v14, 0.0  ;;  %v422_v17 = vpop.f32.mrf.mxu1  ;;  %823 = vmatmul.msk.bf16.gmra.mxu3 %vm213_vm4, %v813_v13 }
  0xe3   :  { %v1086_v18 = vpack.c.bf16 %v456_v16, %v455_v15 }
  0xe6   :  { %v277_v19 = vpop.f32.mrf.mxu0 }
  0xe7   :  { %v1088_v20 = vadd.f32 %v420_v12, %v277_v19 }
  0xe9   :  { %v425_v21 = vpop.f32.mrf.mxu1  ;;  %v457_v16 = vmax.f32 %v1088_v20, 0.0  ;;  %v800_v20 = vld [vmem:[#allocation6] sm:$0xf] }
  0xee   :  { %v279_v22 = vpop.f32.mrf.mxu0 }
  0xef   :  { %v423_v6 = vadd.f32 %v422_v17, %v279_v22  ;;  %v850_v17 = vld [vmem:[#allocation6 + $0x24] sm:$0xf]  ;;  %v818_v22 = vld [vmem:[#allocation6 + $0x28] sm:$0xf0] }
  0xf1   :  { %v427_v26 = vpop.f32.mrf.mxu1  ;;  %v458_v14 = vmax.f32 %v423_v6, 0.0 }
  0xf3   :  { %v479_v19 = vpack.c.bf16 %v458_v14, %v457_v16 }
  0xf6   :  { %v282_v25 = vpop.f32.mrf.mxu0 }
  0xf7   :  { %v426_v2 = vadd.f32 %v425_v21, %v282_v25  ;;  %v489_v21 = vld [vmem:[#allocation7 + $0x20] sm:$0xff]  ;;  %v821_v25 = vor.u32 %v850_v17, %v818_v22 }
  0xf8   :  { %514 = vperm.xlu0 %867, %v489_v21  }
  0xf9   :  { %v430_v30 = vpop.f32.mrf.mxu1  ;;  %v459_v12 = vmax.f32 %v426_v2, 0.0  ;;  %824 = vmatmul.msk.bf16.gmra.mxu3 %vm213_vm4, %v821_v25 }
  0xfe   :  { %v284_v29 = vpop.f32.mrf.mxu0 }
  0xff   :  { %v428_v61 = vadd.f32 %v427_v26, %v284_v29  ;;  %v847_v26 = vld [vmem:[#allocation6 + $0x4] sm:$0xf0]  ;;  %v474_v29 = vld [vmem:[#allocation6 + $0x30] sm:$0x11] }
 0x100   :  { %499 = vperm.xlu0 %867, %v486_v24   ;;  %v801_v27 = vor.u32 %v847_v26, %v800_v20 }
 0x101   :  { %v432_v43 = vpop.f32.mrf.mxu1  ;;  %v460_v7 = vmax.f32 %v428_v61, 0.0 }
 0x103   :  { %v480_v15 = vpack.c.bf16 %v460_v7, %v459_v12 }
 0x106   :  { %v287_v37 = vpop.f32.mrf.mxu0 }
 0x107   :  { %v431_v58 = vadd.f32 %v430_v30, %v287_v37  ;;  %v547_v30 = vunpack.c.h.b16 %v474_v29  ;;  %v546_v37 = vunpack.c.l.b16 %v474_v29 }
 0x109   :  { %v435_v47 = vpop.f32.mrf.mxu1  ;;  %v461_v4 = vmax.f32 %v431_v58, 0.0  ;;  %v555_v31 = vpack.c.b16 %v547_v30, %v547_v30  ;;  %v554_v38 = vpack.c.b16 %v546_v37, %v546_v37 }
 0x10b   :  { %825 = vmatmul.msk.bf16.gmra.mxu3 %vm213_vm4, %v555_v31 }
 0x10e   :  { %v289_v46 = vpop.f32.mrf.mxu0 }
 0x10f   :  { %v433_v56 = vadd.f32 %v432_v43, %v289_v46 }
 0x111   :  { %v437_v53 = vpop.f32.mrf.mxu1  ;;  %v462_v62 = vmax.f32 %v433_v56, 0.0 }
 0x113   :  { %v481_v8 = vpack.c.bf16 %v462_v62, %v461_v4 }
 0x116   :  { %v292_v48 = vpop.f32.mrf.mxu0 }
 0x117   :  { %v436_v52 = vadd.f32 %v435_v47, %v292_v48 }
 0x119   :  { %v463_v59 = vmax.f32 %v436_v52, 0.0 }
 0x11e   :  { %v294_v55 = vpop.f32.mrf.mxu0 }
 0x11f   :  { %v438_v57 = vadd.f32 %v437_v53, %v294_v55 }
 0x121   :  { %v464_v60 = vmax.f32 %v438_v57, 0.0 }
 0x123   :  { %v482_v0 = vpack.c.bf16 %v464_v60, %v463_v59 }
 0x125   :  { %575 = vmatpush.bf16.msrb.mxu2 %v482_v0 }
 0x129   :  { %576 = vmatpush.bf16.msrb.mxu2 %v481_v8 }
 0x12d   :  { %577 = vmatpush.bf16.msrb.mxu2 %v480_v15 }
 0x131   :  { %578 = vmatpush.bf16.msrb.mxu2 %v479_v19 }
 0x135   :  { %579 = vmatpush.bf16.msrb.mxu2 %v1086_v18  ;;  %v488_v18 = vld [vmem:[#allocation7 + $0x18] sm:$0xff] }
 0x136   :  { %509 = vperm.xlu2 %869, %v488_v18  }
 0x139   :  { %580 = vmatpush.bf16.msrb.mxu2 %v1084_v9  ;;  %v485_v9 = vld [vmem:[#allocation7] sm:$0xff] }
 0x13d   :  { %581 = vmatpush.bf16.msrb.mxu2 %v1082_v63  ;;  %v809_v63 = vor.u32 %v849_v33, %v808_v32 }
 0x13e   :  { %494 = vperm.xlu2 %869, %v485_v9  }
 0x141   :  { %582 = vmatpush.bf16.msrb.mxu2 %v1080_v54  ;;  %v643_v54 = vld [vmem:[%s1117_s7] sm:$0xff] }
 0x142   :  { %646 = vperm.xlu1 %868, %v643_v54  }
 0x144   :  { %583 = vmatmul.bf16.vlgmr.msrb.gmra.mxu2 %v801_v27 }
 0x145   :  { %v525_v42 = vpop.permute.xlu0 %524 }
 0x146   :  { %v520_v52 = vpop.permute.xlu1 %519 }
 0x14e   :  { %v612_v39 = vpop.f32.mrf.mxu3  ;;  %v505_v0 = vpop.permute.xlu1 %504 }
 0x154   :  { %588 = vmatmul.bf16.gmra.mxu2 %v809_v63 }
 0x156   :  { %v614_v40 = vpop.f32.mrf.mxu3 }
 0x164   :  { %593 = vmatmul.bf16.gmra.mxu2 %v817_v36  ;;  %v617_v41 = vpop.f32.mrf.mxu3 }
 0x16a   :  { %v515_v46 = vpop.permute.xlu0 %514 }
 0x16c   :  { %v619_v43 = vpop.f32.mrf.mxu3 }
 0x172   :  { %v500_v51 = vpop.permute.xlu0 %499 }
 0x174   :  { %598 = vmatmul.bf16.gmra.mxu2 %v554_v38 }
 0x17c   :  { %v622_v45 = vpop.f32.mrf.mxu3 }
 0x184   :  { %v624_v49 = vpop.f32.mrf.mxu3 }
 0x18e   :  { %v627_v57 = vpop.f32.mrf.mxu3 }
 0x190   :  { %v510_v44 = vpop.permute.xlu2 %509 }
 0x196   :  { %v629_v1 = vpop.f32.mrf.mxu3 }
 0x198   :  { %v495_v48 = vpop.permute.xlu2 %494 }
 0x1b4   :  { %v647_v29 = vpop.permute.xlu1 %646 }
 0x1c7   :  { %v584_v47 = vpop.f32.mrf.mxu2 }
 0x1c8   :  { %v585_v50 = vadd.f32 %v584_v47, %v495_v48 }
 0x1ca   :  { %v613_v55 = vadd.f32 %v612_v39, %v585_v50 }
 0x1cc   :  { %v631_v59 = vmax.f32 %v613_v55, 0.0 }
 0x1cf   :  { %v586_v53 = vpop.f32.mrf.mxu2 }
 0x1d0   :  { %v587_v56 = vadd.f32 %v586_v53, %v500_v51 }
 0x1d2   :  { %v615_v58 = vadd.f32 %v614_v40, %v587_v56 }
 0x1d4   :  { %v632_v60 = vmax.f32 %v615_v58, 0.0 }
 0x1d6   :  { %v639_v61 = vpack.c.bf16 %v632_v60, %v631_v59 }
 0x1d7   :  { %v589_v62 = vpop.f32.mrf.mxu2 }
 0x1d8   :  { %v590_v2 = vadd.f32 %v589_v62, %v505_v0 }
 0x1da   :  { %v618_v5 = vadd.f32 %v617_v41, %v590_v2 }
 0x1dc   :  { %v633_v8 = vmax.f32 %v618_v5, 0.0 }
 0x1df   :  { %v591_v4 = vpop.f32.mrf.mxu2 }
 0x1e0   :  { %v592_v6 = vadd.f32 %v591_v4, %v510_v44 }
 0x1e2   :  { %v620_v7 = vadd.f32 %v619_v43, %v592_v6 }
 0x1e4   :  { %v634_v10 = vmax.f32 %v620_v7, 0.0 }
 0x1e6   :  { %v640_v11 = vpack.c.bf16 %v634_v10, %v633_v8 }
 0x1e7   :  { %v594_v12 = vpop.f32.mrf.mxu2 }
 0x1e8   :  { %v595_v19 = vadd.f32 %v594_v12, %v515_v46 }
 0x1ea   :  { %v623_v22 = vadd.f32 %v622_v45, %v595_v19 }
 0x1ec   :  { %v635_v27 = vmax.f32 %v623_v22, 0.0 }
 0x1ef   :  { %v596_v13 = vpop.f32.mrf.mxu2 }
 0x1f0   :  { %v597_v14 = vadd.f32 %v596_v13, %v520_v52 }
 0x1f2   :  { %v625_v23 = vadd.f32 %v624_v49, %v597_v14 }
 0x1f4   :  { %v636_v25 = vmax.f32 %v625_v23, 0.0 }
 0x1f6   :  { %v641_v18 = vpack.c.bf16 %v636_v25, %v635_v27 }
 0x1f7   :  { %v599_v15 = vpop.f32.mrf.mxu2 }
 0x1f8   :  { %v600_v16 = vadd.f32 %v599_v15, %v525_v42 }
 0x1fa   :  { %v628_v21 = vadd.f32 %v627_v57, %v600_v16 }
 0x1fc   :  { %v637_v17 = vmax.f32 %v628_v21, 0.0 }
 0x1fe   :  { %v642_v24 = vpack.c.bf16 %v637_v17, %v637_v17 }
 0x1ff   :  { %v601_v20 = vpop.f32.mrf.mxu2 }
 0x200   :  { %v655_v26 = vsel %vm653_vm0, %v642_v24, 0 }
 0x201   :  { %661 = vmatpush.bf16.msra.mxu3 %v655_v26 }
 0x205   :  { %662 = vmatpush.bf16.msra.mxu3 %v641_v18 }
 0x209   :  { %663 = vmatpush.bf16.msra.mxu3 %v640_v11 }
 0x20d   :  { %664 = vmatpush.bf16.msra.mxu3 %v639_v61 }
 0x210   :  { %826 = vmatmul.msk.bf16.vlgmr.msra.gmra.mxu3 %vm649_vm13, %v638_v28 }
 0x293   :  { %v666_v30 = vpop.f32.mrf.mxu3 }
 0x294   :  { %v667_v9 = vadd.f32 %v666_v30, %v647_v29 }
 0x296   :  { %v827_v31 = vmul.f32 -1.442695, %v667_v9  ;;  %v671_v37 = vmax.f32 %v667_v9, 0.0 }
 0x298   :  { %870 = vpow2.f32 %v827_v31  ;;  %v672_v42 = vmin.f32 %v671_v37, 1.0 }
 0x29b   :  { %v668_v32 = vpop.f32.mrf.mxu3 }
 0x29e   :  { %v871_v33 = vpop.eup %870 }
 0x29f   :  { %v676_v63 = vadd.f32 1.0, %v871_v33 }
 0x2a1   :  { %872 = vrcp.f32 %v676_v63  ;;  %v688_v36 = vand.u32 2147483648, %v676_v63  ;;  %v686_v39 = vand.u32 2147483647, %v676_v63  ;;  %vm682_vm15 = vweird.f32 %v676_v63 }
 0x2a3   :  { %v689_v41 = vor.u32 1.1754944e-38, %v688_v36  ;;  %vm687_vm4 = vcmp.eq.f32.partialorder %v686_v39, 8.507059e+37 }
 0x2a7   :  { %v873_v54 = vpop.eup %872 }
 0x2a8   :  { %v678_v34 = vmul.f32 %v873_v54, %v676_v63  ;;  %vm683_vm14 = vweird.f32 %v873_v54 }
 0x2a9   :  { %vm684_vm3 = vmor %vm682_vm15, %vm683_vm14 }
 0x2aa   :  { %v679_v35 = vsub.f32 1.0, %v678_v34 }
 0x2ac   :  { %v680_v38 = vmul.f32 %v873_v54, %v679_v35 }
 0x2ae   :  { %v681_v40 = vadd.f32 %v873_v54, %v680_v38 }
 0x2b0   :  { %v685_v43 = vsel %vm684_vm3, %v873_v54, %v681_v40 }
 0x2b1   :  { %v690_v44 = vsel %vm687_vm4, %v689_v41, %v685_v43 }
 0x2b2   :  { %v692_v45 = vsel %vm670_vm1, %v672_v42, %v690_v44 }
 0x2b3   :  { %693 = vst [vmem:[%s1118_s8] sm:$0xff] %v692_v45 }
 0x2b4   :  { %698 = vsyncpa [#allocation3], 1 }
 0x2b5   :  { %699 = vsyncpa [#allocation5], 1 }
 0x2b6   :  { %700 = vsyncpa [#allocation8], 1 }

</bundles_post_ra>
